<compile_context>
chip_gen: v7x
topology: tpu7x:2x2x1
jax: 0.10.0
libtpu: 0.0.40
codegen_flags: <defaults>
</compile_context>

<pallas_src>
import functools

import jax
import jax.numpy as jnp
from jax.experimental import pallas as pl
from jax.experimental.pallas import tpu as pltpu


def _round_up(n, m):
    return ((n + m - 1) // m) * m


def _dyn_kernel(x_ref, wf_ref, bf_ref, w2_ref, b2_ref, w3_ref, b3_ref, o_ref,
                *, x_dim, h_off):
    """One batch tile. All activations are feature-major: (features, TB)."""
    x = x_ref[...]                      # (aug_dim, TB), batch on lanes
    wf = wf_ref[...]                    # (h_off + H, aug_dim)  fused stage-0 weight
    w2 = w2_ref[...]
    w3 = w3_ref[...]

    # Stage 0 (fused): one MXU pass over x yields BOTH the linear skip path
    # (rows [0:x_dim]) and the first res_net pre-activation (rows [h_off:]).
    # Both slices start on a sublane-aligned (multiple-of-8) row.
    z = jnp.dot(wf, x, preferred_element_type=jnp.float32) + bf_ref[...]
    lin = z[0:x_dim, :]                         # lin_layer(aug_x), bias included
    h = jnp.maximum(z[h_off:, :], 0.0)          # ReLU(res_net layer 0)

    # res_net layer 2 -> ReLU -> layer 4 (f32 accumulation; downcast only to
    # feed the next MXU op).
    h = h.astype(w2.dtype)
    h = jnp.dot(w2, h, preferred_element_type=jnp.float32) + b2_ref[...]
    h = jnp.maximum(h, 0.0).astype(w3.dtype)
    res = jnp.dot(w3, h, preferred_element_type=jnp.float32) + b3_ref[...]

    o_ref[...] = (lin + res).astype(o_ref.dtype)


def prepare_params(params, compute_dtype=jnp.float32):
    """One-time parameter prep (call at load time, NOT per forward).

    Weights keep the native PyTorch (out_features, in_features) layout, which
    is already the correct orientation for the feature-major product W @ X.
    lin_layer's weight/bias and the first res_net layer's weight/bias are
    fused into one sublane-aligned block so the kernel touches x with a single
    matmul.  Biases stay f32 columns; `compute_dtype=bfloat16` is the
    recommended weight/activation storage on v6e / v7x, keep f32 on v5e.
    """
    lin_w = jnp.asarray(params["lin_w"], jnp.float32)       # (x_dim, aug)
    lin_b = jnp.asarray(params["lin_b"], jnp.float32)
    w1 = jnp.asarray(params["w1"], jnp.float32)             # (H, aug)
    b1 = jnp.asarray(params["b1"], jnp.float32)

    x_dim, aug = lin_w.shape
    hidden = w1.shape[0]
    h_off = _round_up(x_dim, 8)                             # sublane-aligned split

    w_first = jnp.zeros((h_off + hidden, aug), jnp.float32)
    w_first = w_first.at[:x_dim].set(lin_w).at[h_off:].set(w1)
    b_first = jnp.zeros((h_off + hidden, 1), jnp.float32)
    b_first = b_first.at[:x_dim, 0].set(lin_b).at[h_off:, 0].set(b1)

    def col(b):
        return jnp.asarray(b, jnp.float32).reshape(-1, 1)

    return dict(
        w_first=w_first.astype(compute_dtype), b_first=b_first,
        w2=jnp.asarray(params["w2"], compute_dtype), b2=col(params["b2"]),
        w3=jnp.asarray(params["w3"], compute_dtype), b3=col(params["b3"]),
    )


@functools.partial(jax.jit, static_argnames=("block_b",))
def dynamics_forward(aug_x, prepared, *, block_b=2048):
    """aug_x: (B, x_dim + u_dim) f32. Returns (B, x_dim) f32."""
    B, aug_dim = aug_x.shape
    wf, bf = prepared["w_first"], prepared["b_first"]
    w2, b2 = prepared["w2"], prepared["b2"]
    w3, b3 = prepared["w3"], prepared["b3"]
    x_dim, hidden = w3.shape
    h_off = wf.shape[0] - hidden
    compute_dtype = wf.dtype

    # Batch tiling: lanes want multiples of 128; large tiles amortize the
    # per-grid-step overhead of this mem/overhead-bound kernel while keeping
    # VMEM use at ~O(100 KiB) per buffer.
    if B <= block_b:
        tb = max(128, _round_up(B, 128))
        b_pad = tb
    else:
        tb = block_b
        b_pad = _round_up(B, tb)
    grid = (b_pad // tb,)

    # Feature-major input slab, batch on the lane axis, zero-padded to b_pad.
    # (Boundary transpose/pad is layout plumbing; the kernel itself is dense.)
    x_fm = jnp.transpose(aug_x).astype(compute_dtype)        # (aug_dim, B)
    if b_pad != B:
        x_fm = jnp.pad(x_fm, ((0, 0), (0, b_pad - B)))

    def resident(arr):
        # Constant block index -> fetched once, stays in VMEM across grid steps.
        return pl.BlockSpec(arr.shape, lambda i: (0, 0))

    kernel = functools.partial(_dyn_kernel, x_dim=x_dim, h_off=h_off)

    out_fm = pl.pallas_call(
        kernel,
        out_shape=jax.ShapeDtypeStruct((x_dim, b_pad), jnp.float32),
        grid=grid,
        in_specs=[
            pl.BlockSpec((aug_dim, tb), lambda i: (0, i)),   # x tile
            resident(wf), resident(bf),
            resident(w2), resident(b2),
            resident(w3), resident(b3),
        ],
        out_specs=pl.BlockSpec((x_dim, tb), lambda i: (0, i)),
        compiler_params=pltpu.CompilerParams(
            dimension_semantics=("parallel",)),
    )(x_fm, wf, bf, w2, b2, w3, b3)

    # Back to batch-major, drop batch padding.
    return jnp.transpose(out_fm)[:B]


def init_params(key, x_dim, u_dim, hidden):
    """PyTorch-default Linear init; weights stored in PyTorch (out, in) layout."""
    aug = x_dim + u_dim
    ks = jax.random.split(key, 8)

    def lin(kw, kb, fan_in, fan_out):
        bound = 1.0 / jnp.sqrt(fan_in)
        w = jax.random.uniform(kw, (fan_out, fan_in), jnp.float32, -bound, bound)
        b = jax.random.uniform(kb, (fan_out,), jnp.float32, -bound, bound)
        return w, b

    lin_w, lin_b = lin(ks[0], ks[1], aug, x_dim)       # lin_layer
    w1, b1 = lin(ks[2], ks[3], aug, hidden)            # res_net layer 0
    w2, b2 = lin(ks[4], ks[5], hidden, hidden)         # res_net layer 2
    w3, b3 = lin(ks[6], ks[7], hidden, x_dim)          # res_net layer 4
    return dict(lin_w=lin_w, lin_b=lin_b,
                w1=w1, b1=b1, w2=w2, b2=b2, w3=w3, b3=b3)


def reference_forward(aug_x, params):
    """Pure-JAX reference of OpenLoopDynamicsResidual.forward."""
    with jax.default_matmul_precision("highest"):
        h = jnp.maximum(aug_x @ params["w1"].T + params["b1"], 0.0)
        h = jnp.maximum(h @ params["w2"].T + params["b2"], 0.0)
        res = h @ params["w3"].T + params["b3"]
        lin = aug_x @ params["lin_w"].T + params["lin_b"]
    return lin + res


if __name__ == "__main__":
    X_DIM, U_DIM, HIDDEN, B = 4, 2, 32, 8

    key = jax.random.PRNGKey(0)
    k_x, k_p = jax.random.split(key)
    params = init_params(k_p, X_DIM, U_DIM, HIDDEN)
    aug_x = jax.random.normal(k_x, (B, X_DIM + U_DIM), jnp.float32)
    ref = reference_forward(aug_x, params)

    # --- f32 path (default; also the recommended elementwise path on v5e) ---
    prep_f32 = prepare_params(params, jnp.float32)
    out = jax.block_until_ready(dynamics_forward(aug_x, prep_f32))
    assert out.shape == (B, X_DIM)
    assert jnp.allclose(out, ref, atol=1e-4, rtol=1e-4), "f32 kernel mismatch"

    # --- larger batch with a small tile: exercises multi-tile grid + padding ---
    B2 = 1000
    aug_x2 = jax.random.normal(jax.random.PRNGKey(1), (B2, X_DIM + U_DIM),
                               jnp.float32)
    out2 = jax.block_until_ready(dynamics_forward(aug_x2, prep_f32, block_b=256))
    ref2 = reference_forward(aug_x2, params)
    assert out2.shape == (B2, X_DIM)
    assert jnp.allclose(out2, ref2, atol=1e-4, rtol=1e-4), "tiled kernel mismatch"

    # --- bf16 storage path (v6e/v7x: halves HBM traffic; f32 accumulation) ---
    prep_bf16 = prepare_params(params, jnp.bfloat16)
    out_bf16 = jax.block_until_ready(dynamics_forward(aug_x, prep_bf16))
    assert out_bf16.shape == (B, X_DIM)
    assert bool(jnp.all(jnp.isfinite(out_bf16)))
    assert jnp.allclose(out_bf16, ref, atol=1e-1, rtol=1e-1), "bf16 kernel mismatch"

    print("KERNEL_OK")
</pallas_src>

<mosaic_0001>
module attributes {stable_mosaic.version = 11 : i64} {
  func.func @_dyn_kernel(%arg0: i32, %arg1: memref<6x128xf32, #tpu.memory_space<vmem>>, %arg2: memref<40x6xf32, #tpu.memory_space<vmem>>, %arg3: memref<40x1xf32, #tpu.memory_space<vmem>>, %arg4: memref<32x32xf32, #tpu.memory_space<vmem>>, %arg5: memref<32x1xf32, #tpu.memory_space<vmem>>, %arg6: memref<4x32xf32, #tpu.memory_space<vmem>>, %arg7: memref<4x1xf32, #tpu.memory_space<vmem>>, %arg8: memref<4x128xf32, #tpu.memory_space<vmem>>) attributes {dimension_semantics = [#tpu.dimension_semantics<parallel>], iteration_bounds = array<i64: 1>, scalar_prefetch = 0 : i64, scratch_operands = 0 : i64, tpu.core_type = #tpu.core_type<tc>, window_params = [{transform_indices = @transform_0, window_bounds = array<i64: 6, 128>}, {pipeline_mode = #tpu.pipeline_mode<synchronous>, transform_indices = @transform_1, window_bounds = array<i64: 40, 6>}, {pipeline_mode = #tpu.pipeline_mode<synchronous>, transform_indices = @transform_2, window_bounds = array<i64: 40, 1>}, {pipeline_mode = #tpu.pipeline_mode<synchronous>, transform_indices = @transform_3, window_bounds = array<i64: 32, 32>}, {pipeline_mode = #tpu.pipeline_mode<synchronous>, transform_indices = @transform_4, window_bounds = array<i64: 32, 1>}, {pipeline_mode = #tpu.pipeline_mode<synchronous>, transform_indices = @transform_5, window_bounds = array<i64: 4, 32>}, {pipeline_mode = #tpu.pipeline_mode<synchronous>, transform_indices = @transform_6, window_bounds = array<i64: 4, 1>}, {transform_indices = @transform_7, window_bounds = array<i64: 4, 128>}]} {
    %c0 = arith.constant 0 : index
    %c0_0 = arith.constant 0 : index
    %0 = vector.load %arg1[%c0, %c0_0] : memref<6x128xf32, #tpu.memory_space<vmem>>, vector<6x128xf32>
    %c0_1 = arith.constant 0 : index
    %c0_2 = arith.constant 0 : index
    %1 = vector.load %arg2[%c0_1, %c0_2] : memref<40x6xf32, #tpu.memory_space<vmem>>, vector<40x6xf32>
    %c0_3 = arith.constant 0 : index
    %c0_4 = arith.constant 0 : index
    %2 = vector.load %arg4[%c0_3, %c0_4] : memref<32x32xf32, #tpu.memory_space<vmem>>, vector<32x32xf32>
    %c0_5 = arith.constant 0 : index
    %c0_6 = arith.constant 0 : index
    %3 = vector.load %arg6[%c0_5, %c0_6] : memref<4x32xf32, #tpu.memory_space<vmem>>, vector<4x32xf32>
    %cst = arith.constant dense<0.000000e+00> : vector<40x128xf32>
    %4 = tpu.matmul %1, %0, %cst {dimension_numbers = #tpu.dot_dimension_numbers<[1], [0], [0], [1], [0, 0, 1, 1], [], []>} : vector<40x6xf32>, vector<6x128xf32>, vector<40x128xf32> -> vector<40x128xf32>
    %c0_7 = arith.constant 0 : index
    %c0_8 = arith.constant 0 : index
    %5 = vector.load %arg3[%c0_7, %c0_8] : memref<40x1xf32, #tpu.memory_space<vmem>>, vector<40x1xf32>
    %6 = vector.broadcast %5 : vector<40x1xf32> to vector<40x128xf32>
    %7 = arith.addf %4, %6 : vector<40x128xf32>
    %8 = vector.extract_strided_slice %7 {offsets = [0, 0], sizes = [4, 128], strides = [1, 1]} : vector<40x128xf32> to vector<4x128xf32>
    %9 = vector.extract_strided_slice %7 {offsets = [8, 0], sizes = [32, 128], strides = [1, 1]} : vector<40x128xf32> to vector<32x128xf32>
    %cst_9 = arith.constant 0.000000e+00 : f32
    %10 = vector.broadcast %cst_9 : f32 to vector<32x128xf32>
    %11 = arith.maximumf %9, %10 : vector<32x128xf32>
    %cst_10 = arith.constant dense<0.000000e+00> : vector<32x128xf32>
    %12 = tpu.matmul %2, %11, %cst_10 {dimension_numbers = #tpu.dot_dimension_numbers<[1], [0], [0], [1], [0, 0, 1, 1], [], []>} : vector<32x32xf32>, vector<32x128xf32>, vector<32x128xf32> -> vector<32x128xf32>
    %c0_11 = arith.constant 0 : index
    %c0_12 = arith.constant 0 : index
    %13 = vector.load %arg5[%c0_11, %c0_12] : memref<32x1xf32, #tpu.memory_space<vmem>>, vector<32x1xf32>
    %14 = vector.broadcast %13 : vector<32x1xf32> to vector<32x128xf32>
    %15 = arith.addf %12, %14 : vector<32x128xf32>
    %cst_13 = arith.constant 0.000000e+00 : f32
    %16 = vector.broadcast %cst_13 : f32 to vector<32x128xf32>
    %17 = arith.maximumf %15, %16 : vector<32x128xf32>
    %cst_14 = arith.constant dense<0.000000e+00> : vector<4x128xf32>
    %18 = tpu.matmul %3, %17, %cst_14 {dimension_numbers = #tpu.dot_dimension_numbers<[1], [0], [0], [1], [0, 0, 1, 1], [], []>} : vector<4x32xf32>, vector<32x128xf32>, vector<4x128xf32> -> vector<4x128xf32>
    %c0_15 = arith.constant 0 : index
    %c0_16 = arith.constant 0 : index
    %19 = vector.load %arg7[%c0_15, %c0_16] : memref<4x1xf32, #tpu.memory_space<vmem>>, vector<4x1xf32>
    %20 = vector.broadcast %19 : vector<4x1xf32> to vector<4x128xf32>
    %21 = arith.addf %18, %20 : vector<4x128xf32>
    %22 = arith.addf %8, %21 : vector<4x128xf32>
    %c0_17 = arith.constant 0 : index
    %c0_18 = arith.constant 0 : index
    %23 = vector.load %arg8[%c0_17, %c0_18] : memref<4x128xf32, #tpu.memory_space<vmem>>, vector<4x128xf32>
    tpu.vector_store %arg8[%c0_17, %c0_18], %22 {strides = array<i32>} : memref<4x128xf32, #tpu.memory_space<vmem>>, vector<4x128xf32>,
    return
  }
  func.func @transform_0(%arg0: i32) -> (i32, i32) {
    %c0_i32 = arith.constant 0 : i32
    %c0_i32_0 = arith.constant 0 : i32
    return %c0_i32, %arg0 : i32, i32
  }
  func.func @transform_1(%arg0: i32) -> (i32, i32) {
    %c0_i32 = arith.constant 0 : i32
    %c0_i32_0 = arith.constant 0 : i32
    %c0_i32_1 = arith.constant 0 : i32
    return %c0_i32, %c0_i32_0 : i32, i32
  }
  func.func @transform_2(%arg0: i32) -> (i32, i32) {
    %c0_i32 = arith.constant 0 : i32
    %c0_i32_0 = arith.constant 0 : i32
    %c0_i32_1 = arith.constant 0 : i32
    return %c0_i32, %c0_i32_0 : i32, i32
  }
  func.func @transform_3(%arg0: i32) -> (i32, i32) {
    %c0_i32 = arith.constant 0 : i32
    %c0_i32_0 = arith.constant 0 : i32
    %c0_i32_1 = arith.constant 0 : i32
    return %c0_i32, %c0_i32_0 : i32, i32
  }
  func.func @transform_4(%arg0: i32) -> (i32, i32) {
    %c0_i32 = arith.constant 0 : i32
    %c0_i32_0 = arith.constant 0 : i32
    %c0_i32_1 = arith.constant 0 : i32
    return %c0_i32, %c0_i32_0 : i32, i32
  }
  func.func @transform_5(%arg0: i32) -> (i32, i32) {
    %c0_i32 = arith.constant 0 : i32
    %c0_i32_0 = arith.constant 0 : i32
    %c0_i32_1 = arith.constant 0 : i32
    return %c0_i32, %c0_i32_0 : i32, i32
  }
  func.func @transform_6(%arg0: i32) -> (i32, i32) {
    %c0_i32 = arith.constant 0 : i32
    %c0_i32_0 = arith.constant 0 : i32
    %c0_i32_1 = arith.constant 0 : i32
    return %c0_i32, %c0_i32_0 : i32, i32
  }
  func.func @transform_7(%arg0: i32) -> (i32, i32) {
    %c0_i32 = arith.constant 0 : i32
    %c0_i32_0 = arith.constant 0 : i32
    return %c0_i32, %arg0 : i32, i32
  }
}

</mosaic_0001>

<bundles_post_ra>
// kernel: dynamics_forward.1
= control target key start
LH: loop header
LB: loop body
LE: loop exit
PB: predicated region body
PF: predicated region fallthrough
CT: control target
= control target key end

     0   :  { %vm84_vm0 = vcmask 1045504   ;;  %v526_v2 = vmov 0.0   ;;  %vm527_vm1 = vmmov 0   ;;  %vm68_vm2 = vcmask 48128   ;;  %s662_s0 = inlined_call_operand.vmem [shape: f32[6,128], index: 0, kind: input, shape index: {}]   ;;  %s663_s1 = inlined_call_operand.vmem [shape: f32[40,6], index: 1, kind: input, shape index: {}]   ;;  %s664_s2 = inlined_call_operand.vmem [shape: f32[40,1], index: 2, kind: input, shape index: {}]   ;;  %s665_s3 = inlined_call_operand.vmem [shape: f32[32,32], index: 3, kind: input, shape index: {}]   ;;  %s666_s4 = inlined_call_operand.vmem [shape: f32[32,1], index: 4, kind: input, shape index: {}]   ;;  %s667_s5 = inlined_call_operand.vmem [shape: f32[4,32], index: 5, kind: input, shape index: {}]   ;;  %s668_s6 = inlined_call_operand.vmem [shape: f32[4,1], index: 6, kind: input, shape index: {}]   ;;  %s669_s7 = inlined_call_operand.hbm [shape: f32[4,128], index: 7, kind: output, shape index: {}]  }
   0x1   :  { %v27_v0 = vld [vmem:[%s662_s0] sm:$0x3f]  ;;  %433 = vmatprep.subr.mxu0 %v526_v2  ;;  %435 = vmatprep.mubr.msk.f32.mxu0 %vm527_vm1, %v526_v2  ;;  %v31_v3 = vld [vmem:[%s663_s1 + $0x18] sm:$0xff]  ;;  %v29_v4 = vld [vmem:[%s663_s1 + $0x8] sm:$0xff]  ;;  %v528_v6 = vmov 0  }
   0x2   :  { %v28_v1 = vld [vmem:[%s663_s1] sm:$0xff]  ;;  %434 = vmatpush3.msk.msra.mxu0 %vm84_vm0, %v27_v0  ;;  %489 = vmatprep.subr.mxu1 %v526_v2  ;;  %v41_v5 = vld [vmem:[%s664_s2 + $0x18] sm:$0xff]  ;;  %v39_v7 = vld [vmem:[%s664_s2 + $0x8] sm:$0xff] }
   0x3   :  { %436 = vmatmul.mubr.msk.f32.vlgmr.msra.gmra.mrb[0].mxu0 %vm68_vm2, %v28_v1  ;;  %490 = vmatpush3.msk.msra.mxu1 %vm84_vm0, %v27_v0 }
   0x4   :  { %438 = vmatprep.mubr.msk.f32.mxu0 %vm527_vm1, %v526_v2  ;;  %444 = vmatprep.mubr.msk.f32.mxu1 %vm527_vm1, %v526_v2 }
   0x5   :  { %445 = vmatmul.mubr.msk.f32.vlgmr.msra.gmra.mrb[0].mxu1 %vm68_vm2, %v31_v3  ;;  %501 = vset.pattern.permute.xlu1 %v528_v6 }
   0x6   :  { %12 = vsyncpa [#allocation3], 0  ;;  %447 = vmatprep.mubr.msk.f32.mxu1 %vm527_vm1, %v526_v2  ;;  %v32_v8 = vld [vmem:[%s663_s1 + $0x20] sm:$0xff]  ;;  %500 = vset.pattern.permute.xlu0 %v528_v6  ;;  %v30_v9 = vld [vmem:[%s663_s1 + $0x10] sm:$0xff]  ;;  %vm206_vm3 = vcmask 261120   ;;  %v529_v44 = vmov 0.0|0.0  }
   0x7   :  { %439 = vmatmul.mubr.msk.f32.gmra.mrb[2].mxu0 %vm68_vm2, %v29_v4  ;;  %60 = vperm.xlu1 %501, %v41_v5   ;;  %v42_v10 = vld [vmem:[%s664_s2 + $0x20] sm:$0xff]  ;;  %v40_v11 = vld [vmem:[%s664_s2 + $0x10] sm:$0xff]  ;;  %v183_v12 = vld [vmem:[%s666_s4 + $0x8] sm:$0xff]  ;;  %s530_s13 = smov [#allocation2]  }
   0x8   :  { %441 = vmatprep.mubr.msk.f32.mxu0 %vm527_vm1, %v526_v2  ;;  %50 = vperm.xlu0 %500, %v39_v7   ;;  %v182_v13 = vld [vmem:[%s666_s4] sm:$0xff]  ;;  %v185_v14 = vld [vmem:[%s666_s4 + $0x18] sm:$0xff]  ;;  %v184_v15 = vld [vmem:[%s666_s4 + $0x10] sm:$0xff]  ;;  %s395_s14 = sshll.u32 %s530_s13, 4  ;;  %s396_s14 = int_to_ptr.vmem [resolvable:$true] %s395_s14 }
   0x9   :  { %448 = vmatmul.mubr.msk.f32.gmra.mrb[2].mxu1 %vm68_vm2, %v32_v8  ;;  %v308_v16 = vld [vmem:[%s668_s6] sm:$0xf]  ;;  %v34_v41 = vld [vmem:[%s665_s3 + $0x8] sm:$0xff]  ;;  %v35_v42 = vld [vmem:[%s665_s3 + $0x10] sm:$0xff]  ;;  %483 = vmatprep.subr.bf16.mxu0 %v529_v44  ;;  %s502_s15 = scalar_lea.vmem %s396_s14, 64  ;;  %p507_p1 = scmp.lt.s32.totalorder %s396_s14, %s396_s14 }
   0xa   :  { %v38_v17 = vld [vmem:[%s664_s2] sm:$0xff]  ;;  %v36_v43 = vld [vmem:[%s665_s3 + $0x18] sm:$0xff]  ;;  %p503_p0 = scmp.ne.s32.totalorder %s396_s14, %s502_s15  ;;  %p508_p2 = scmp.lt.s32.totalorder %s502_s15, %s502_s15 }
   0xb   :  { %442 = vmatmul.mubr.msk.f32.gmra.mrb[4].mxu0 %vm68_vm2, %v30_v9  ;;  %65 = vperm.xlu1 %501, %v42_v10   ;;  %v33_v18 = vld [vmem:[%s665_s3] sm:$0xff] }
   0xc   :  { %55 = vperm.xlu0 %500, %v40_v11   ;;  %472 = vmatprep.mubr.msk.f32.mxu0 %vm527_vm1, %v526_v2  ;;  %v37_v63 = vld [vmem:[%s667_s5] sm:$0xf]  ;;  %p509_p3 = por %p508_p2, %p507_p1 }
   0xd   :  { %458 = vmatprep.mubr.msk.f32.mxu1 %vm206_vm3, %v33_v18 }
   0xe   :  { %p510_p4 = pnand %p509_p3, %p503_p0 }
   0xf   :  { %193 = vperm.xlu1 %501, %v183_v12  }
  0x10   :  { %188 = vperm.xlu0 %500, %v182_v13  }
  0x13   :  { %203 = vperm.xlu1 %501, %v185_v14  }
  0x14   :  { %198 = vperm.xlu0 %500, %v184_v15  }
  0x17   :  { %311 = vperm.xlu1 %501, %v308_v16  }
  0x18   :  { %45 = vperm.xlu0 %500, %v38_v17  }
  0x86   :  { %v61_v19 = vpop.permute.xlu1 %60 }
  0x87   :  { %v51_v20 = vpop.permute.xlu0 %50 }
  0x8a   :  { %v66_v26 = vpop.permute.xlu1 %65 }
  0x8b   :  { %v56_v32 = vpop.permute.xlu0 %55 }
  0x8e   :  { %v194_v45 = vpop.permute.xlu1 %193 }
  0x8f   :  { %v189_v46 = vpop.permute.xlu0 %188 }
  0x92   :  { %v204_v52 = vpop.permute.xlu1 %203 }
  0x93   :  { %v199_v55 = vpop.permute.xlu0 %198 }
  0x96   :  { %v312_v0 = vpop.permute.xlu1 %311 }
  0x97   :  { %v46_v1 = vpop.permute.xlu0 %45 }
  0x98   :  { %v491_v2 = vadd.f32 %v312_v0, %v46_v1 }
  0xd8   :  { %v169_v21 = vpop.f32.mrb[0].mxu1 }
  0xd9   :  { %v170_v22 = vadd.f32 %v169_v21, %v61_v19  ;;  %v446_v23 = vpop.f32.mrb[1].mxu1 }
  0xda   :  { %v159_v24 = vpop.f32.mrb[2].mxu0 }
  0xdb   :  { %v440_v25 = vpop.f32.mrb[3].mxu0  ;;  %v160_v28 = vadd.f32 %v159_v24, %v51_v20  ;;  %v180_v29 = vmax.f32 %v170_v22, 0.0 }
  0xdc   :  { %v174_v27 = vpop.f32.mrb[2].mxu1 }
  0xdd   :  { %v175_v30 = vadd.f32 %v174_v27, %v66_v26  ;;  %v449_v31 = vpop.f32.mrb[3].mxu1  ;;  %v178_v37 = vmax.f32 %v160_v28, 0.0 }
  0xde   :  { %v164_v33 = vpop.f32.mrb[4].mxu0 }
  0xdf   :  { %v165_v34 = vadd.f32 %v164_v33, %v56_v32  ;;  %v181_v35 = vmax.f32 %v175_v30, 0.0  ;;  %v443_v36 = vpop.f32.mrb[5].mxu0 }
  0xe1   :  { %v179_v38 = vmax.f32 %v165_v34, 0.0  ;;  %v479_v39 = vpack.c.bf16 %v181_v35, %v180_v29 }
  0xe3   :  { %v475_v40 = vpack.c.bf16 %v179_v38, %v178_v37 }
  0xe5   :  { %476 = vmatprep.subr.bf16.mxu1 %v475_v40 }
  0xe6   :  { %478 = vmatpush3.bf16.msra.mxu1 %v475_v40 }
  0xe7   :  { %480 = vmatprep.subr.bf16.mxu1 %v479_v39 }
  0xea   :  { %482 = vmatpush3.bf16.msra.mxu1 %v479_v39 }
  0xed   :  { %459 = vmatmul.mubr.msk.f32.vlgmr.msra.gmra.mrb[4].mxu1 %vm206_vm3, %v34_v41 }
  0xee   :  { %461 = vmatprep.mubr.msk.f32.mxu1 %vm206_vm3, %v35_v42 }
  0xf1   :  { %462 = vmatmul.mubr.msk.f32.gmra.mrb[6].mxu1 %vm206_vm3, %v36_v43 }
 0x1c0   :  { %v460_v47 = vpop.f32.mrb[4].mxu1 }
 0x1c1   :  { %v291_v48 = vadd.f32 %v460_v47, %v194_v45  ;;  %v285_v49 = vpop.f32.mrb[5].mxu1 }
 0x1c2   :  { %v286_v50 = vadd.f32 %v285_v49, %v189_v46 }
 0x1c3   :  { %v305_v51 = vmax.f32 %v291_v48, 0.0 }
 0x1c4   :  { %v304_v53 = vmax.f32 %v286_v50, 0.0  ;;  %v463_v54 = vpop.f32.mrb[6].mxu1 }
 0x1c5   :  { %v301_v56 = vadd.f32 %v463_v54, %v204_v52  ;;  %v295_v57 = vpop.f32.mrb[7].mxu1 }
 0x1c6   :  { %v484_v58 = vpack.c.bf16 %v305_v51, %v304_v53  ;;  %v296_v59 = vadd.f32 %v295_v57, %v199_v55 }
 0x1c7   :  { %v307_v60 = vmax.f32 %v301_v56, 0.0 }
 0x1c8   :  { %v306_v61 = vmax.f32 %v296_v59, 0.0  ;;  %485 = vmatpush3.bf16.msra.mxu0 %v484_v58 }
 0x1c9   :  { %486 = vmatprep.subr.bf16.mxu0 %v529_v44 }
 0x1ca   :  { %v487_v62 = vpack.c.bf16 %v307_v60, %v306_v61 }
 0x1cc   :  { %488 = vmatpush3.bf16.msra.mxu0 %v487_v62 }
 0x1cf   :  { %473 = vmatmul.mubr.msk.f32.vlgmr.msra.gmra.mrb[0].mxu0 %vm206_vm3, %v37_v63 }
 0x2a2   :  { %v383_v3 = vpop.f32.mrb[0].mxu0 }
 0x2a3   :  { %v492_v4 = vadd.f32 %v491_v2, %v383_v3  ;;  %v474_v5 = vpop.f32.mrb[1].mxu0 }
 0x2a5   :  { %388 = vst [vmem:[#allocation2] sm:$0xf] %v492_v4 }
 0x2a6   :  { %513 = shalt.err (!%p510_p4)
}
 0x2a7   :  { %s514_s17 = scalar_lea.hbm %s669_s7, 64 }
 0x2a8   :  { %p515_p5 = scmp.ne.s32.totalorder %s669_s7, %s514_s17  ;;  %p518_p6 = scmp.lt.u32.totalorder %s514_s17, %s669_s7 }
 0x2aa   :  { %p520_p7 = pnand %p518_p6, %p515_p5 }
 0x2ac   :  { %523 = shalt.err (!%p520_p7)
}
 0x2ad   :  { %398 = dma.vmem_to_hbm [thread:$0]  %s396_s14, 64, %s669_s7, [#allocation3]  }
 0x2ae   :  { %524 = dma.done.wait [#allocation3], 64  }
 0x2af   :  { %525 = vsyncadd [#allocation3], 4294967232 }
 0x2b0   :  { %402 = vsyncpa [#allocation3], 1 }

</bundles_post_ra>
